<compile_context>
chip_gen: v7x
topology: tpu7x:2x2x1
jax: 0.10.0
libtpu: 0.0.40
codegen_flags: <defaults>
</compile_context>

<pallas_src>
import functools

import jax
import jax.numpy as jnp
from jax.experimental import pallas as pl
from jax.experimental.pallas import tpu as pltpu

MIB = 1024 * 1024


def _vmem_capacity_bytes():
    """Physical VMEM per TensorCore; conservative fallback if query fails."""
    try:
        info = pltpu.get_tpu_info()
        cap = getattr(info, "vmem_capacity_bytes", None)
        if cap:
            return int(cap)
    except Exception:
        pass
    return 64 * MIB  # v7x per-TC size; safe lower bound for v5e/v6e as well


def _round_up(x, m):
    return ((x + m - 1) // m) * m


def _clamp_limit(need_bytes, cap):
    """vmem_limit_bytes: enough for the blocks + scratch headroom, under cap."""
    return int(min(max(need_bytes, 32 * MIB), cap - 8 * MIB))


# ---------------------------------------------------------------------------
# Fused single pass: pool + Wd/Wu MLP + sigmoid + per-channel scale
# ---------------------------------------------------------------------------
def cam_fused_kernel(x_ref, wd_ref, bd_ref, wu_ref, bu_ref, o_ref):
    # x_ref/o_ref: (1, C, HW) one full batch element (native dtype)
    # wd_ref: (Cr, C) f32, pre-scaled by 1/HW;  bd_ref: (Cr, 1) f32
    # wu_ref: (C, Cr) f32;                      bu_ref: (C, 1) f32
    x = x_ref[0]                                                   # (C, HW)
    # Spatial sum as an MXU matvec (f32 accumulation, no f32 copy of the tile).
    ones = jnp.ones((x.shape[-1], 1), dtype=x.dtype)
    pooled = jnp.dot(x, ones, preferred_element_type=jnp.float32)  # (C, 1)
    h = jnp.dot(wd_ref[...], pooled,
                preferred_element_type=jnp.float32) + bd_ref[...]  # (Cr, 1)
    a = jnp.dot(wu_ref[...], h,
                preferred_element_type=jnp.float32) + bu_ref[...]  # (C, 1)
    gate = jax.nn.sigmoid(a)                                       # (C, 1) f32
    o_ref[0] = x * gate.astype(x.dtype)


# ---------------------------------------------------------------------------
# Fallback pass 1: tiled (masked) spatial sum -> partial sums per (b, split)
# ---------------------------------------------------------------------------
def _cam_pool_kernel(x_ref, psum_ref, *, hw, thw, n_ts):
    # x_ref:    (1, C, thw)     one spatial tile (native dtype)
    # psum_ref: (1, 1, C, 1)    f32 partial sum for this (batch, split)
    s = pl.program_id(1)
    t = pl.program_id(2)

    @pl.when(t == 0)
    def _():
        psum_ref[...] = jnp.zeros_like(psum_ref)

    x = x_ref[0]                                                   # (C, thw)
    # Mask lanes beyond HW (ragged edge tile / fully out-of-range split tile).
    start = (s * n_ts + t) * thw
    lane = jax.lax.broadcasted_iota(jnp.int32, x.shape, 1)
    x = jnp.where(start + lane < hw, x, jnp.zeros_like(x))
    ones = jnp.ones((thw, 1), dtype=x.dtype)
    psum_ref[0, 0] += jnp.dot(x, ones, preferred_element_type=jnp.float32)


# ---------------------------------------------------------------------------
# Fallback pass 2: out = gate * x, tiled over (batch, spatial tiles)
# ---------------------------------------------------------------------------
def _cam_scale_kernel(g_ref, x_ref, o_ref):
    # g_ref: (1, C, 1); x_ref / o_ref: (1, C, thw)
    o_ref[...] = x_ref[...] * g_ref[...]


def cam_forward(x_nchw, wd, bd, wu, bu, *, force_two_pass=False,
                _tile_budget_bytes=None):
    """x_nchw: (B, C, H, W); wd: (C//r, C); bd: (C//r,); wu: (C, C//r); bu: (C,)."""
    B, C, H, W = x_nchw.shape
    Cr = wd.shape[0]
    HW = H * W
    itemsize = jnp.dtype(x_nchw.dtype).itemsize

    x_flat = x_nchw.reshape(B, C, HW)                 # contiguous reshape: free
    cap = _vmem_capacity_bytes()

    # f32 compute params; the 1/HW of the adaptive-avg-pool mean folded into Wd.
    wd_s = wd.astype(jnp.float32) * (1.0 / HW)        # (Cr, C)
    bd_c = bd.astype(jnp.float32).reshape(Cr, 1)      # (Cr, 1)
    wu_c = wu.astype(jnp.float32)                     # (C, Cr)
    bu_c = bu.astype(jnp.float32).reshape(C, 1)       # (C, 1)
    param_bytes = 4 * (Cr * C + Cr + C * Cr + C)

    slab = C * HW * itemsize                          # one batch element of x
    fused_slab_budget = cap // 6                      # ~10 MiB v7x, ~21 MiB v5e/v6e

    if slab <= fused_slab_budget and not force_two_pass:
        # ---- Fused single pass: 1 read + 1 write of the x slab.
        need = 4 * slab + 2 * param_bytes + 8 * MIB   # double-buffered in + out
        out_flat = pl.pallas_call(
            cam_fused_kernel,
            out_shape=jax.ShapeDtypeStruct((B, C, HW), x_nchw.dtype),
            grid_spec=pltpu.PrefetchScalarGridSpec(
                num_scalar_prefetch=0,
                grid=(B,),
                in_specs=[
                    pl.BlockSpec((1, C, HW), lambda b: (b, 0, 0)),   # x (full element)
                    pl.BlockSpec((Cr, C), lambda b: (0, 0)),         # Wd / HW
                    pl.BlockSpec((Cr, 1), lambda b: (0, 0)),         # bd
                    pl.BlockSpec((C, Cr), lambda b: (0, 0)),         # Wu
                    pl.BlockSpec((C, 1), lambda b: (0, 0)),          # bu
                ],
                out_specs=pl.BlockSpec((1, C, HW), lambda b: (b, 0, 0)),
            ),
            compiler_params=pltpu.CompilerParams(
                dimension_semantics=("parallel",),
                vmem_limit_bytes=_clamp_limit(need, cap)),
        )(x_flat, wd_s, bd_c, wu_c, bu_c)
        return out_flat.reshape(B, C, H, W)

    # ------------------------------------------------------------------
    # Fallback: two passes for large C*HW (ragged cdiv tiling, no padding)
    # ------------------------------------------------------------------
    tile_budget = _tile_budget_bytes if _tile_budget_bytes else cap // 16
    hw_pad = _round_up(HW, 128)
    max_thw = max(128, (tile_budget // max(1, C * itemsize)) // 128 * 128)
    if max_thw >= hw_pad:
        thw = HW                                     # whole spatial axis (full-dim block)
    else:
        thw = max_thw                                # largest 128-multiple in budget
    n_t = pl.cdiv(HW, thw)
    nsplit = 2 if n_t >= 2 else 1                    # use both v7x TCs even at B == 1
    n_ts = pl.cdiv(n_t, nsplit)
    last_blk = n_t - 1
    tile_bytes = C * thw * itemsize

    # ---- Pass 1: partial spatial sums -> (B, nsplit, C, 1) f32
    pool_kernel = functools.partial(_cam_pool_kernel, hw=HW, thw=thw, n_ts=n_ts)
    partials = pl.pallas_call(
        pool_kernel,
        out_shape=jax.ShapeDtypeStruct((B, nsplit, C, 1), jnp.float32),
        grid_spec=pltpu.PrefetchScalarGridSpec(
            num_scalar_prefetch=0,
            grid=(B, nsplit, n_ts),
            in_specs=[
                # Clamp the block index so over-shooting split tiles never DMA
                # out of range; their contribution is zero-masked in-kernel.
                pl.BlockSpec(
                    (1, C, thw),
                    lambda b, s, t: (b, 0, jnp.minimum(s * n_ts + t, last_blk))),
            ],
            out_specs=pl.BlockSpec((1, 1, C, 1), lambda b, s, t: (b, s, 0, 0)),
        ),
        compiler_params=pltpu.CompilerParams(
            dimension_semantics=("parallel", "parallel", "arbitrary"),
            vmem_limit_bytes=_clamp_limit(2 * tile_bytes + 8 * MIB, cap)),
    )(x_flat)

    # Tiny squeeze/excite MLP + sigmoid as a batched XLA matmul on (B, C).
    pooled_sum = jnp.sum(partials[..., 0], axis=1)              # (B, C) f32
    h = pooled_sum @ wd_s.T + bd.astype(jnp.float32)            # (B, Cr); 1/HW in wd_s
    a = h @ wu_c.T + bu.astype(jnp.float32)                     # (B, C)
    gate = jax.nn.sigmoid(a).astype(x_nchw.dtype).reshape(B, C, 1)

    # ---- Pass 2: out = gate * x (ragged edge tile: OOB output stores clipped)
    out_flat = pl.pallas_call(
        _cam_scale_kernel,
        out_shape=jax.ShapeDtypeStruct((B, C, HW), x_nchw.dtype),
        grid_spec=pltpu.PrefetchScalarGridSpec(
            num_scalar_prefetch=0,
            grid=(B, n_t),
            in_specs=[
                pl.BlockSpec((1, C, 1), lambda b, t: (b, 0, 0)),     # gate
                pl.BlockSpec((1, C, thw), lambda b, t: (b, 0, t)),   # x tile
            ],
            out_specs=pl.BlockSpec((1, C, thw), lambda b, t: (b, 0, t)),
        ),
        compiler_params=pltpu.CompilerParams(
            dimension_semantics=("parallel", "parallel"),
            vmem_limit_bytes=_clamp_limit(4 * tile_bytes + 8 * MIB, cap)),
    )(gate, x_flat)

    return out_flat.reshape(B, C, H, W)


def cam_reference(x_nchw, wd, bd, wu, bu):
    """Pure-JAX reference matching the PyTorch module."""
    pooled = jnp.mean(x_nchw, axis=(2, 3))            # (B, C)
    h = pooled @ wd.T + bd                            # (B, C//r)
    a = h @ wu.T + bu                                 # (B, C)
    s = jax.nn.sigmoid(a)                             # (B, C)
    return s[:, :, None, None] * x_nchw


if __name__ == "__main__":
    # Small shapes consistent with the module: channels divisible by r=16.
    B, C, H, W = 2, 64, 8, 8
    r = 16
    Cr = C // r

    key = jax.random.PRNGKey(0)
    kx, kwd, kbd, kwu, kbu = jax.random.split(key, 5)

    x = jax.random.normal(kx, (B, C, H, W), dtype=jnp.float32)

    # PyTorch Linear shapes: weight=(out, in), bias=(out,)
    wd = jax.random.normal(kwd, (Cr, C), dtype=jnp.float32) * 0.1   # Wd.weight
    bd = jax.random.normal(kbd, (Cr,), dtype=jnp.float32) * 0.1     # Wd.bias
    wu = jax.random.normal(kwu, (C, Cr), dtype=jnp.float32) * 0.1   # Wu.weight
    bu = jax.random.normal(kbu, (C,), dtype=jnp.float32) * 0.1      # Wu.bias

    # Fused single-pass path (default for shapes that fit VMEM).
    out = jax.block_until_ready(cam_forward(x, wd, bd, wu, bu))
    ref = cam_reference(x, wd, bd, wu, bu)
    assert out.shape == (B, C, H, W)
    assert jnp.allclose(out, ref, atol=2e-5, rtol=2e-5), "fused path mismatch"

    # Two-pass fallback path, forced small tiles: exercises ragged edge tiles,
    # the 2-way spatial split, masking, and the clamped out-of-range split tile.
    x2 = jax.random.normal(kx, (1, C, 18, 18), dtype=jnp.float32)   # HW=324 (not /128)
    out2 = jax.block_until_ready(
        cam_forward(x2, wd, bd, wu, bu, force_two_pass=True,
                    _tile_budget_bytes=1))
    ref2 = cam_reference(x2, wd, bd, wu, bu)
    assert out2.shape == x2.shape
    assert jnp.allclose(out2, ref2, atol=2e-5, rtol=2e-5), "two-pass path mismatch"

    print("KERNEL_OK")
</pallas_src>

<mosaic_0001>
module attributes {stable_mosaic.version = 11 : i64} {
  func.func @cam_fused_kernel(%arg0: i32, %arg1: memref<1x64x64xf32, #tpu.memory_space<vmem>>, %arg2: memref<4x64xf32, #tpu.memory_space<vmem>>, %arg3: memref<4x1xf32, #tpu.memory_space<vmem>>, %arg4: memref<64x4xf32, #tpu.memory_space<vmem>>, %arg5: memref<64x1xf32, #tpu.memory_space<vmem>>, %arg6: memref<1x64x64xf32, #tpu.memory_space<vmem>>) attributes {dimension_semantics = [#tpu.dimension_semantics<parallel>], iteration_bounds = array<i64: 2>, scalar_prefetch = 0 : i64, scratch_operands = 0 : i64, tpu.core_type = #tpu.core_type<tc>, window_params = [{transform_indices = @transform_0, window_bounds = array<i64: 1, 64, 64>}, {pipeline_mode = #tpu.pipeline_mode<synchronous>, transform_indices = @transform_1, window_bounds = array<i64: 4, 64>}, {pipeline_mode = #tpu.pipeline_mode<synchronous>, transform_indices = @transform_2, window_bounds = array<i64: 4, 1>}, {pipeline_mode = #tpu.pipeline_mode<synchronous>, transform_indices = @transform_3, window_bounds = array<i64: 64, 4>}, {pipeline_mode = #tpu.pipeline_mode<synchronous>, transform_indices = @transform_4, window_bounds = array<i64: 64, 1>}, {transform_indices = @transform_5, window_bounds = array<i64: 1, 64, 64>}]} {
    %c0 = arith.constant 0 : index
    %c0_0 = arith.constant 0 : index
    %c0_1 = arith.constant 0 : index
    %0 = vector.load %arg1[%c0, %c0_0, %c0_1] : memref<1x64x64xf32, #tpu.memory_space<vmem>>, vector<1x64x64xf32>
    %1 = vector.shape_cast %0 : vector<1x64x64xf32> to vector<64x64xf32>
    %cst = arith.constant 1.000000e+00 : f32
    %2 = vector.broadcast %cst : f32 to vector<64x1xf32>
    %cst_2 = arith.constant dense<0.000000e+00> : vector<64x1xf32>
    %3 = tpu.matmul %1, %2, %cst_2 {dimension_numbers = #tpu.dot_dimension_numbers<[1], [0], [0], [1], [0, 0, 1, 1], [], []>} : vector<64x64xf32>, vector<64x1xf32>, vector<64x1xf32> -> vector<64x1xf32>
    %c0_3 = arith.constant 0 : index
    %c0_4 = arith.constant 0 : index
    %4 = vector.load %arg2[%c0_3, %c0_4] : memref<4x64xf32, #tpu.memory_space<vmem>>, vector<4x64xf32>
    %cst_5 = arith.constant dense<0.000000e+00> : vector<4x1xf32>
    %5 = tpu.matmul %4, %3, %cst_5 {dimension_numbers = #tpu.dot_dimension_numbers<[1], [0], [0], [1], [0, 0, 1, 1], [], []>} : vector<4x64xf32>, vector<64x1xf32>, vector<4x1xf32> -> vector<4x1xf32>
    %c0_6 = arith.constant 0 : index
    %c0_7 = arith.constant 0 : index
    %6 = vector.load %arg3[%c0_6, %c0_7] : memref<4x1xf32, #tpu.memory_space<vmem>>, vector<4x1xf32>
    %7 = arith.addf %5, %6 : vector<4x1xf32>
    %c0_8 = arith.constant 0 : index
    %c0_9 = arith.constant 0 : index
    %8 = vector.load %arg4[%c0_8, %c0_9] : memref<64x4xf32, #tpu.memory_space<vmem>>, vector<64x4xf32>
    %cst_10 = arith.constant dense<0.000000e+00> : vector<64x1xf32>
    %9 = tpu.matmul %8, %7, %cst_10 {dimension_numbers = #tpu.dot_dimension_numbers<[1], [0], [0], [1], [0, 0, 1, 1], [], []>} : vector<64x4xf32>, vector<4x1xf32>, vector<64x1xf32> -> vector<64x1xf32>
    %c0_11 = arith.constant 0 : index
    %c0_12 = arith.constant 0 : index
    %10 = vector.load %arg5[%c0_11, %c0_12] : memref<64x1xf32, #tpu.memory_space<vmem>>, vector<64x1xf32>
    %11 = arith.addf %9, %10 : vector<64x1xf32>
    %12 = arith.negf %11 : vector<64x1xf32>
    %13 = math.exp %12 : vector<64x1xf32>
    %cst_13 = arith.constant 1.000000e+00 : f32
    %14 = vector.broadcast %cst_13 : f32 to vector<64x1xf32>
    %15 = arith.addf %14, %13 : vector<64x1xf32>
    %16 = arith.divf %14, %15 : vector<64x1xf32>
    %17 = vector.broadcast %16 : vector<64x1xf32> to vector<64x64xf32>
    %18 = arith.mulf %1, %17 : vector<64x64xf32>
    %c0_14 = arith.constant 0 : index
    %c0_15 = arith.constant 0 : index
    %c0_16 = arith.constant 0 : index
    %19 = vector.load %arg6[%c0_14, %c0_15, %c0_16] : memref<1x64x64xf32, #tpu.memory_space<vmem>>, vector<1x64x64xf32>
    %20 = vector.shape_cast %19 : vector<1x64x64xf32> to vector<64x64xf32>
    %21 = vector.shape_cast %18 : vector<64x64xf32> to vector<1x64x64xf32>
    tpu.vector_store %arg6[%c0_14, %c0_15, %c0_16], %21 {strides = array<i32>} : memref<1x64x64xf32, #tpu.memory_space<vmem>>, vector<1x64x64xf32>,
    return
  }
  func.func @transform_0(%arg0: i32) -> (i32, i32, i32) {
    %c0_i32 = arith.constant 0 : i32
    %c0_i32_0 = arith.constant 0 : i32
    %c0_i32_1 = arith.constant 0 : i32
    return %arg0, %c0_i32, %c0_i32_0 : i32, i32, i32
  }
  func.func @transform_1(%arg0: i32) -> (i32, i32) {
    %c0_i32 = arith.constant 0 : i32
    %c0_i32_0 = arith.constant 0 : i32
    %c0_i32_1 = arith.constant 0 : i32
    return %c0_i32, %c0_i32_0 : i32, i32
  }
  func.func @transform_2(%arg0: i32) -> (i32, i32) {
    %c0_i32 = arith.constant 0 : i32
    %c0_i32_0 = arith.constant 0 : i32
    %c0_i32_1 = arith.constant 0 : i32
    return %c0_i32, %c0_i32_0 : i32, i32
  }
  func.func @transform_3(%arg0: i32) -> (i32, i32) {
    %c0_i32 = arith.constant 0 : i32
    %c0_i32_0 = arith.constant 0 : i32
    %c0_i32_1 = arith.constant 0 : i32
    return %c0_i32, %c0_i32_0 : i32, i32
  }
  func.func @transform_4(%arg0: i32) -> (i32, i32) {
    %c0_i32 = arith.constant 0 : i32
    %c0_i32_0 = arith.constant 0 : i32
    %c0_i32_1 = arith.constant 0 : i32
    return %c0_i32, %c0_i32_0 : i32, i32
  }
  func.func @transform_5(%arg0: i32) -> (i32, i32, i32) {
    %c0_i32 = arith.constant 0 : i32
    %c0_i32_0 = arith.constant 0 : i32
    %c0_i32_1 = arith.constant 0 : i32
    return %arg0, %c0_i32, %c0_i32_0 : i32, i32, i32
  }
}

</mosaic_0001>

<bundles_post_ra>
// kernel: tpu_custom_call.1
= control target key start
LH: loop header
LB: loop body
LE: loop exit
PB: predicated region body
PF: predicated region fallthrough
CT: control target
= control target key end

     0   :  { %10 = vsyncpa [#allocation3], 0  ;;  %s1321_s0 = inlined_call_operand.vmem [shape: f32[2,64,64], index: 0, kind: input, shape index: {}]   ;;  %s1322_s1 = inlined_call_operand.vmem [shape: f32[4,64], index: 1, kind: input, shape index: {}]   ;;  %s1323_s2 = inlined_call_operand.vmem [shape: f32[4,1], index: 2, kind: input, shape index: {}]   ;;  %s1324_s3 = inlined_call_operand.vmem [shape: f32[64,4], index: 3, kind: input, shape index: {}]   ;;  %s1325_s4 = inlined_call_operand.vmem [shape: f32[64,1], index: 4, kind: input, shape index: {}]   ;;  %s1326_s5 = inlined_call_operand.hbm [shape: f32[2,64,64], index: 5, kind: output, shape index: {}]  }
   0x1   :  { %12 = vsyncpa [#allocation3 + $0x1], 0  ;;  %s1103_s18 = smov 0   ;;  %s1105_s19 = smov 0  }
   0x2   :  { %s1107_s20 = smov 0   ;;  %s1109_s21 = smov 0  }
   0x3 LB: > { %s1124_s22 = sadd.s32 4294967295, %s1063_s21   ;;  %s766_s23 = sadd.s32 4294967294, %s1063_s21   ;;  %s1063_s21 = sphi %s1109_s21, %s1332_s21   ;;  %s1059_s20 = sphi %s1107_s20, %s1331_s20   ;;  %s1055_s19 = sphi %s1105_s19, %s1330_s19   ;;  %s1051_s18 = sphi %s1103_s18, %s1329_s18  }
   0x4   : > { %s1128_s24 = sadd.s32 1, %s1063_s21   ;;  %s135_s25 = sadd.s32 1, %s1059_s20 }
   0x5   : > { %s132_s26 = ssub.s32 %s1063_s21, %s1128_s24  ;;  %p145_p0 = scmp.ne.s32.totalorder %s1059_s20, %s1055_s19 }
   0x6   : > { %p133_p1 = scmp.eq.s32.totalorder %s132_s26, 0  ;;  %p146_p2 = scmp.eq.s32.totalorder %s1124_s22, 1 }
   0x7   : > { %p151_p3 = scmp.ne.s32.totalorder %s1055_s19, %s1051_s18  ;;  %p152_p4 = scmp.eq.s32.totalorder %s766_s23, 1 }
   0x8   : > { %s1139_s27 = scalar_select %p133_p1, %s1059_s20, %s135_s25  }
   0x9   : > { %p1141_p5 = por %p146_p2, %p145_p0  ;;  %p1145_p6 = por %p152_p4, %p151_p3 }
   0xa   : > { %p769_p7 = scmp.ge.s32.totalorder %s1063_s21, 1  ;;  %p190_p8 = scmp.lt.s32.totalorder %s1063_s21, 3 }
   0xc   : > { %p191_p9 = pnand %p769_p7, %p190_p8 }
   0xd   : > { %p218_p10 = scmp.lt.s32.totalorder (!%p191_p9), %s1124_s22, 1  ;;  %v1065_v0 = vmov (!%p191_p9), 1.0|1.0   ;;  %vm231_vm0 = vcmask (!%p191_p9), 523264   ;;  %v1066_v9 = vmov (!%p191_p9), 0.0|0.0   ;;  %vm1067_vm1 = vmmov (!%p191_p9), 0  }
   0xe   : > { %194 = sbr.rel (%p191_p9) target bundleno = 877 (0x36d), region = 40  ;;  %901 = vmatprep.subr.bf16.mxu0 (!%p191_p9), %v1065_v0  ;;  %909 = vmatprep.subr.bf16.mxu1 (!%p191_p9), %v1066_v9  ;;  %v1068_v10 = vmov (!%p191_p9), 0.0   ;;  %v361_v23 = vld [vmem:[%s1322_s1] sm:$0xf] (!%p191_p9)  ;;  %vm452_vm2 = vcmask (!%p191_p9), 31744   ;;  %vm477_vm3 = vcmask (!%p191_p9), 1043456  }
   0xf   : > { %902 = vmatpush3.bf16.msra.mxu0 (!%p191_p9), %v1065_v0  ;;  %884 = vmatprep.mubr.msk.f32.mxu1 (!%p191_p9), %vm1067_vm1, %v1068_v10  ;;  %v436_v24 = vld [vmem:[%s1324_s3] sm:$0xff] (!%p191_p9)  ;;  %v437_v29 = vld [vmem:[%s1324_s3 + $0x8] sm:$0xff] (!%p191_p9)  ;;  %v438_v30 = vld [vmem:[%s1324_s3 + $0x10] sm:$0xff] (!%p191_p9)  ;;  %v1069_v36 = vmov (!%p191_p9), 0   ;;  %s215_s14 = sand.u32 (!%p191_p9), 1, %s1055_s19   ;;  %s805_s17 = sshll.u32 (!%p191_p9), %s1124_s22, 10 }
  0x10   : > { %903 = vmatprep.subr.bf16.mxu0 (!%p191_p9), %v1065_v0  ;;  %v362_v25 = vld [vmem:[%s1323_s2] sm:$0xf] (!%p191_p9)  ;;  %v439_v31 = vld [vmem:[%s1324_s3 + $0x18] sm:$0xff] (!%p191_p9)  ;;  %v441_v33 = vld [vmem:[%s1324_s3 + $0x28] sm:$0xff] (!%p191_p9)  ;;  %967 = vset.pattern.permute.xlu0 (!%p191_p9), %v1069_v36  ;;  %s770_s15 = sshll.u32 (!%p191_p9), %s215_s14, 6  ;;  %s1070_s7 = smov (!%p191_p9), [#allocation2]  }
  0x11   : > { %v440_v32 = vld [vmem:[%s1324_s3 + $0x20] sm:$0xff] (!%p191_p9)  ;;  %v442_v34 = vld [vmem:[%s1324_s3 + $0x30] sm:$0xff] (!%p191_p9)  ;;  %v443_v35 = vld [vmem:[%s1324_s3 + $0x38] sm:$0xff] (!%p191_p9)  ;;  %968 = vset.pattern.permute.xlu1 (!%p191_p9), %v1069_v36  ;;  %s217_s16 = scalar_lea.vmem (!%p191_p9), [#allocation2], %s770_s15  ;;  %s1005_s8 = sshll.u32 (!%p191_p9), %s1070_s7, 4  ;;  %s1006_s8 = int_to_ptr.vmem [resolvable:$false] %s1005_s8 }
  0x12   : > { %v445_v37 = vld [vmem:[%s1325_s4 + $0x8] sm:$0xff] (!%p191_p9)  ;;  %v444_v38 = vld [vmem:[%s1325_s4] sm:$0xff] (!%p191_p9)  ;;  %v447_v43 = vld [vmem:[%s1325_s4 + $0x18] sm:$0xff] (!%p191_p9)  ;;  %s704_s23 = sshll.u32 (!%p191_p9), %s217_s16, 4  ;;  %s1273_s23 = int_to_ptr.vmem [resolvable:$true] %s704_s23 }
  0x13   : > { %904 = vmatpush3.bf16.msra.mxu0 (!%p191_p9), %v1065_v0  ;;  %v446_v45 = vld [vmem:[%s1325_s4 + $0x10] sm:$0xff] (!%p191_p9)  ;;  %v449_v51 = vld [vmem:[%s1325_s4 + $0x28] sm:$0xff] (!%p191_p9)  ;;  %v448_v53 = vld [vmem:[%s1325_s4 + $0x20] sm:$0xff] (!%p191_p9)  ;;  %p1008_p0 = scmp.lt.s32.totalorder (!%p191_p9), %s1273_s23, %s1006_s8 }
  0x14   : > { %905 = vmatprep.subr.bf16.mxu0 (!%p191_p9), %v1065_v0  ;;  %v451_v59 = vld [vmem:[%s1325_s4 + $0x38] sm:$0xff] (!%p191_p9)  ;;  %v450_v61 = vld [vmem:[%s1325_s4 + $0x30] sm:$0xff] (!%p191_p9) }
  0x15   : > { %s219_s30 = scalar_select %p218_p10, %s1124_s22, 1 }
  0x16   : > { %s1280_s22 = scalar_lea.sflag [#allocation3], %s215_s14 }
  0x17   : > { %s804_s6 = sshll.u32 %s219_s30, 6  ;;  %906 = vmatpush3.bf16.msra.mxu0 %v1065_v0  ;;  %s1271_s30 = scalar_lea.hbm %s1326_s5, %s805_s17 }
  0x18   : > { %s222_s9 = scalar_lea.vmem %s1321_s0, %s804_s6  ;;  %907 = vmatprep.subr.bf16.mxu0 %v1065_v0  ;;  %s1001_s6 = scalar_lea.vmem %s1273_s23, 1024 }
  0x19   : > { %v1156_v1 = vld [vmem:[%s222_s9] sm:$0xff]  ;;  %v1160_v2 = vld [vmem:[%s222_s9 + $0x8] sm:$0xff]  ;;  %v1162_v3 = vld [vmem:[%s222_s9 + $0x10] sm:$0xff]  ;;  %p1002_p11 = scmp.ne.s32.totalorder %s1273_s23, %s1001_s6 }
  0x1a   : > { %856 = vmatprep.mubr.msk.f32.mxu0 %vm231_vm0, %v1156_v1  ;;  %v1168_v4 = vld [vmem:[%s222_s9 + $0x18] sm:$0xff]  ;;  %v1170_v5 = vld [vmem:[%s222_s9 + $0x20] sm:$0xff]  ;;  %v1176_v6 = vld [vmem:[%s222_s9 + $0x28] sm:$0xff] }
  0x1b   : > { %908 = vmatpush3.bf16.msra.mxu0 %v1065_v0  ;;  %v1178_v7 = vld [vmem:[%s222_s9 + $0x30] sm:$0xff]  ;;  %v1184_v8 = vld [vmem:[%s222_s9 + $0x38] sm:$0xff]  ;;  %p1003_p12 = pnand %p1002_p11, %p1141_p5  ;;  %s1007_s9 = scalar_lea.vmem %s1006_s8, 2048 }
  0x1c   : > { %p1009_p1 = scmp.lt.s32.totalorder %s1007_s9, %s1001_s6 }
  0x1d   : > { %p1004_p13 = pneg %p1003_p12 }
  0x1e   : > { %857 = vmatmul.mubr.msk.f32.vlgmr.msra.gmra.mrb[0].mxu0 %vm231_vm0, %v1160_v2  ;;  %p1010_p2 = por %p1009_p1, %p1008_p0 }
  0x1f   : > { %859 = vmatprep.mubr.msk.f32.mxu0 %vm231_vm0, %v1162_v3 }
  0x20   : > { %p1011_p3 = pnand %p1010_p2, %p1004_p13 }
  0x22   : > { %860 = vmatmul.mubr.msk.f32.gmra.mrb[2].mxu0 %vm231_vm0, %v1168_v4 }
  0x23   : > { %862 = vmatprep.mubr.msk.f32.mxu0 %vm231_vm0, %v1170_v5 }
  0x26   : > { %863 = vmatmul.mubr.msk.f32.gmra.mrb[4].mxu0 %vm231_vm0, %v1176_v6 }
  0x27   : > { %865 = vmatprep.mubr.msk.f32.mxu0 %vm231_vm0, %v1178_v7 }
  0x2a   : > { %866 = vmatmul.mubr.msk.f32.gmra.mrb[6].mxu0 %vm231_vm0, %v1184_v8 }
  0xf1   : > { %v858_v11 = vpop.f32.mrb[0].mxu0 }
  0xf2   : > { %v322_v12 = vpop.f32.mrb[1].mxu0 }
  0xf3   : > { %v910_v13 = vpack.c.bf16 %v858_v11, %v322_v12 }
  0xf5   : > { %v861_v14 = vpop.f32.mrb[2].mxu0  ;;  %911 = vmatpush3.bf16.msra.mxu1 %v910_v13 }
  0xf6   : > { %v332_v15 = vpop.f32.mrb[3].mxu0  ;;  %912 = vmatprep.subr.bf16.mxu1 %v1066_v9 }
  0xf7   : > { %v913_v16 = vpack.c.bf16 %v861_v14, %v332_v15 }
  0xf9   : > { %v864_v17 = vpop.f32.mrb[4].mxu0  ;;  %914 = vmatpush3.bf16.msra.mxu1 %v913_v16 }
  0xfa   : > { %v342_v18 = vpop.f32.mrb[5].mxu0  ;;  %915 = vmatprep.subr.bf16.mxu1 %v1066_v9 }
  0xfb   : > { %v916_v19 = vpack.c.bf16 %v864_v17, %v342_v18 }
  0xfd   : > { %v867_v20 = vpop.f32.mrb[6].mxu0  ;;  %917 = vmatpush3.bf16.msra.mxu1 %v916_v19 }
  0xfe   : > { %v352_v21 = vpop.f32.mrb[7].mxu0  ;;  %918 = vmatprep.subr.bf16.mxu1 %v1066_v9 }
  0xff   : > { %v919_v22 = vpack.c.bf16 %v867_v20, %v352_v21 }
 0x101   : > { %920 = vmatpush3.bf16.msra.mxu1 %v919_v22 }
 0x104   : > { %885 = vmatmul.mubr.msk.f32.vlgmr.msra.gmra.mrb[0].mxu1 %vm231_vm0, %v361_v23 }
 0x105   : > { %889 = vmatprep.mubr.msk.f32.mxu1 %vm452_vm2, %v436_v24 }
 0x1d7   : > { %v432_v26 = vpop.f32.mrb[0].mxu1 }
 0x1d8   : > { %v433_v27 = vadd.f32 %v432_v26, %v362_v25  ;;  %v886_v28 = vpop.f32.mrb[1].mxu1 }
 0x1da   : > { %887 = vmatprep.subr.msk.mxu1 %vm477_vm3, %v433_v27 }
 0x1db   : > { %888 = vmatpush3.msk.msra.mxu1 %vm477_vm3, %v433_v27 }
 0x1dc   : > { %890 = vmatmul.mubr.msk.f32.vlgmr.msra.gmra.mrb[2].mxu1 %vm452_vm2, %v437_v29 }
 0x1dd   : > { %892 = vmatprep.mubr.msk.f32.mxu1 %vm452_vm2, %v438_v30 }
 0x1e0   : > { %893 = vmatmul.mubr.msk.f32.gmra.mrb[4].mxu1 %vm452_vm2, %v439_v31 }
 0x1e1   : > { %895 = vmatprep.mubr.msk.f32.mxu1 %vm452_vm2, %v440_v32 }
 0x1e4   : > { %896 = vmatmul.mubr.msk.f32.gmra.mrb[6].mxu1 %vm452_vm2, %v441_v33 }
 0x1e5   : > { %898 = vmatprep.mubr.msk.f32.mxu1 %vm452_vm2, %v442_v34 }
 0x1e8   : > { %899 = vmatmul.mubr.msk.f32.gmra.mrb[8].mxu1 %vm452_vm2, %v443_v35 }
 0x2af   : > { %v891_v39 = vpop.f32.mrb[2].mxu1 }
 0x2b0   : > { %v553_v40 = vadd.f32 %v891_v39, %v445_v37  ;;  %v547_v41 = vpop.f32.mrb[3].mxu1 }
 0x2b1   : > { %v548_v42 = vadd.f32 %v547_v41, %v444_v38 }
 0x2b2   : > { %v792_v44 = vmul.f32 -1.442695, %v553_v40 }
 0x2b3   : > { %v791_v46 = vmul.f32 -1.442695, %v548_v42  ;;  %v894_v47 = vpop.f32.mrb[4].mxu1 }
 0x2b4   : > { %969 = vpow2.f32 %v792_v44  ;;  %v563_v48 = vadd.f32 %v894_v47, %v447_v43  ;;  %v557_v49 = vpop.f32.mrb[5].mxu1 }
 0x2b5   : > { %971 = vpow2.f32 %v791_v46  ;;  %v558_v50 = vadd.f32 %v557_v49, %v446_v45 }
 0x2b6   : > { %v794_v52 = vmul.f32 -1.442695, %v563_v48 }
 0x2b7   : > { %v793_v54 = vmul.f32 -1.442695, %v558_v50  ;;  %v897_v55 = vpop.f32.mrb[6].mxu1 }
 0x2b8   : > { %973 = vpow2.f32 %v794_v52  ;;  %v573_v56 = vadd.f32 %v897_v55, %v449_v51  ;;  %v567_v57 = vpop.f32.mrb[7].mxu1 }
 0x2b9   : > { %975 = vpow2.f32 %v793_v54  ;;  %v568_v58 = vadd.f32 %v567_v57, %v448_v53 }
 0x2ba   : > { %v796_v60 = vmul.f32 -1.442695, %v573_v56 }
 0x2bb   : > { %v795_v62 = vmul.f32 -1.442695, %v568_v58  ;;  %v900_v63 = vpop.f32.mrb[8].mxu1 }
 0x2bc   : > { %977 = vpow2.f32 %v796_v60  ;;  %v583_v0 = vadd.f32 %v900_v63, %v451_v59  ;;  %v577_v9 = vpop.f32.mrb[9].mxu1 }
 0x2bd   : > { %979 = vpow2.f32 %v795_v62  ;;  %v578_v10 = vadd.f32 %v577_v9, %v450_v61 }
 0x2be   : > { %v970_v11 = vpop.eup %969  ;;  %v798_v12 = vmul.f32 -1.442695, %v583_v0 }
 0x2bf   : > { %v972_v13 = vpop.eup %971  ;;  %v611_v14 = vadd.f32 1.0, %v970_v11  ;;  %v797_v15 = vmul.f32 -1.442695, %v578_v10 }
 0x2c0   : > { %v610_v16 = vadd.f32 1.0, %v972_v13  ;;  %981 = vpow2.f32 %v798_v12 }
 0x2c1   : > { %983 = vrcp.f32 %v611_v14 }
 0x2c2   : > { %v974_v17 = vpop.eup %973  ;;  %985 = vpow2.f32 %v797_v15 }
 0x2c3   : > { %v976_v18 = vpop.eup %975  ;;  %v613_v19 = vadd.f32 1.0, %v974_v17  ;;  %987 = vrcp.f32 %v610_v16 }
 0x2c4   : > { %v612_v20 = vadd.f32 1.0, %v976_v18 }
 0x2c5   : > { %989 = vrcp.f32 %v613_v19 }
 0x2c6   : > { %v978_v21 = vpop.eup %977  ;;  %991 = vrcp.f32 %v612_v20 }
 0x2c7   : > { %v980_v22 = vpop.eup %979  ;;  %v615_v23 = vadd.f32 1.0, %v978_v21 }
 0x2c8   : > { %v614_v24 = vadd.f32 1.0, %v980_v22 }
 0x2ca   : > { %v982_v25 = vpop.eup %981  ;;  %993 = vrcp.f32 %v614_v24 }
 0x2cb   : > { %v984_v26 = vpop.eup %983  ;;  %995 = vrcp.f32 %v615_v23  ;;  %v617_v27 = vadd.f32 1.0, %v982_v25 }
 0x2cc   : > { %641 = vperm.xlu0 %967, %v984_v26   ;;  %v986_v28 = vpop.eup %985 }
 0x2cd   : > { %v988_v29 = vpop.eup %987  ;;  %v616_v30 = vadd.f32 1.0, %v986_v28  ;;  %997 = vrcp.f32 %v617_v27 }
 0x2cf   : > { %v990_v31 = vpop.eup %989  ;;  %999 = vrcp.f32 %v616_v30 }
 0x2d0   : > { %651 = vperm.xlu1 %968, %v990_v31   ;;  %636 = vperm.xlu0 %967, %v988_v29   ;;  %v992_v32 = vpop.eup %991 }
 0x2d4   : > { %v994_v33 = vpop.eup %993  ;;  %646 = vperm.xlu1 %968, %v992_v32  }
 0x2d5   : > { %v996_v34 = vpop.eup %995  ;;  %656 = vperm.xlu0 %967, %v994_v33  }
 0x2d7   : > { %v998_v35 = vpop.eup %997 }
 0x2d8   : > { %661 = vperm.xlu1 %968, %v996_v34  }
 0x2d9   : > { %v1000_v36 = vpop.eup %999 }
 0x2da   : > { %666 = vperm.xlu0 %967, %v1000_v36  }
 0x2dc   : > { %671 = vperm.xlu1 %968, %v998_v35  }
 0x34b   : > { %v642_v37 = vpop.permute.xlu0 %641 }
 0x34c   : > { %v675_v38 = vmul.f32 %v642_v37, %v1160_v2 }
 0x34e   : > { %683 = vst.msk [vmem:[%s217_s16 + $0x8] sm:$0xff] %vm231_vm0, %v675_v38 }
 0x34f   : > { %v652_v39 = vpop.permute.xlu1 %651  ;;  %v637_v40 = vpop.permute.xlu0 %636 }
 0x350   : > { %v677_v41 = vmul.f32 %v652_v39, %v1168_v4  ;;  %v674_v42 = vmul.f32 %v637_v40, %v1156_v1 }
 0x352   : > { %685 = vst.msk [vmem:[%s217_s16 + $0x18] sm:$0xff] %vm231_vm0, %v677_v41  ;;  %682 = vst.msk [vmem:[%s217_s16] sm:$0xff] %vm231_vm0, %v674_v42 }
 0x353   : > { %v647_v43 = vpop.permute.xlu1 %646 }
 0x354   : > { %v676_v44 = vmul.f32 %v647_v43, %v1162_v3  ;;  %v657_v45 = vpop.permute.xlu0 %656 }
 0x355   : > { %v678_v2 = vmul.f32 %v657_v45, %v1170_v5 }
 0x356   : > { %684 = vst.msk [vmem:[%s217_s16 + $0x10] sm:$0xff] %vm231_vm0, %v676_v44 }
 0x357   : > { %686 = vst.msk [vmem:[%s217_s16 + $0x20] sm:$0xff] %vm231_vm0, %v678_v2  ;;  %v662_v46 = vpop.permute.xlu1 %661 }
 0x358   : > { %v679_v4 = vmul.f32 %v662_v46, %v1176_v6 }
 0x359   : > { %v667_v1 = vpop.permute.xlu0 %666 }
 0x35a   : > { %687 = vst.msk [vmem:[%s217_s16 + $0x28] sm:$0xff] %vm231_vm0, %v679_v4  ;;  %v680_v47 = vmul.f32 %v667_v1, %v1178_v7 }
 0x35b   : > { %v672_v3 = vpop.permute.xlu1 %671 }
 0x35c   : > { %v681_v5 = vmul.f32 %v672_v3, %v1184_v8  ;;  %688 = vst.msk [vmem:[%s217_s16 + $0x30] sm:$0xff] %vm231_vm0, %v680_v47 }
 0x35e   : > { %689 = vst.msk [vmem:[%s217_s16 + $0x38] sm:$0xff] %vm231_vm0, %v681_v5 }
 0x35f   : > { %1014 = shalt.err (!%p1011_p3)
}
 0x360   : > { %s1015_s10 = scalar_lea.hbm %s1271_s30, 1024  ;;  %s1019_s13 = scalar_lea.hbm %s1326_s5, 2048 }
 0x361   : > { %p1016_p4 = scmp.ne.s32.totalorder %s1271_s30, %s1015_s10  ;;  %p1020_p9 = scmp.lt.u32.totalorder %s1271_s30, %s1326_s5 }
 0x362   : > { %p1021_p10 = scmp.lt.u32.totalorder %s1019_s13, %s1015_s10  ;;  %p1023_p12 = scmp.lt.u32.totalorder %s1015_s10, %s1271_s30 }
 0x363   : > { %p1017_p7 = pnand %p1016_p4, %p1141_p5 }
 0x364   : > { %p1022_p11 = por %p1021_p10, %p1020_p9 }
 0x365   : > { %p1018_p8 = pneg %p1017_p7 }
 0x366   : > { %p1024_p13 = por %p1023_p12, %p1022_p11 }
 0x368   : > { %p1025_p0 = pnand %p1024_p13, %p1018_p8 }
 0x36a   : > { %1028 = shalt.err (!%p1025_p0)
}
 0x36b   : > { %s1071_s16 = smov 128   ;;  %s1072_s17 = smov 8  }
 0x36c   : > { %921 = dma.vmem_to_hbm [thread:$0]  (%p1141_p5), %s1273_s23, 1024, %s1271_s30, %s1280_s22, %s1071_s16, %s1071_s16, %s1072_s17  }
 0x36d PF: > { %p927_p1 = scmp.ge.s32.totalorder %s1063_s21, 2  ;;  %s719_s25 = sand.u32 1, %s1051_s18  }
 0x36e   : > { %s720_s26 = scalar_lea.sflag [#allocation3], %s719_s25 }
 0x36f   : > { %p924_p2 = pnand %p927_p1, %p1145_p6 }
 0x371   : > { %1046 = dma.done.wait (!%p924_p2), %s720_s26, 1024  }
 0x372   : > { %1048 = vsyncadd (!%p924_p2), %s720_s26, 4294966272  ;;  %p15_p3 = scmp.ge.s32.totalorder %s1128_s24, 4   ;;  %s1329_s18 = smov %s1055_s19 }
 0x373   : > { %s1330_s19 = smov %s1059_s20  ;;  %s1331_s20 = smov %s1139_s27 }
 0x374   : > { %s1332_s21 = smov %s1128_s24  ;;  %17 = sbr.rel (!%p15_p3) target bundleno = 3 (0x3), region = 75 }
 0x37b   :  { %725 = vsyncpa [#allocation3], 1 }
 0x37c   :  { %727 = vsyncpa [#allocation3 + $0x1], 1 }

</bundles_post_ra>
